<compile_context>
chip_gen: v6e
topology: v6e:2x2x1
jax: 0.10.0
libtpu: 0.0.40
codegen_flags: <defaults>
</compile_context>

<pallas_src>
import functools

import jax
import jax.numpy as jnp
from jax.experimental import pallas as pl
from jax.experimental.pallas import tpu as pltpu


# ----------------------------- kernels -------------------------------------

def attention_kernel(x_ref, g_ref, b_ref, wqkv_ref, wo_ref, bout_ref, o_ref,
                     xhat_ref, acc_ref, *, heads, dim_head):
    """Fused Parallel(attention branches) + residual for one batch block.

    grid = (batch_blocks, branch); output block constant across `branch`, so
    acc_ref accumulates  sum_r attn_r(x) + x  and is written on the last branch.
    """
    r = pl.program_id(1)
    nr = pl.num_programs(1)
    bt, n, d = x_ref.shape
    inner = heads * dim_head
    rows = bt * n
    cd = wqkv_ref.dtype                       # compute dtype (bf16 in production)

    @pl.when(r == 0)
    def _():
        xf = x_ref[...].astype(jnp.float32).reshape(rows, d)
        mean = jnp.mean(xf, axis=-1, keepdims=True)
        var = jnp.mean((xf - mean) ** 2, axis=-1, keepdims=True)
        xhat_ref[...] = (xf - mean) * jax.lax.rsqrt(var + 1e-5)  # hoisted LN stats
        acc_ref[...] = xf                                        # residual folded in

    xn = (xhat_ref[...] * g_ref[0] + b_ref[0]).astype(cd)        # (rows, D)

    # Flat lane-dense QKV projection on the MXU (no per-head broadcast).
    qkv = jnp.dot(xn, wqkv_ref[0], preferred_element_type=jnp.float32)  # (rows, 3*inner)
    qkv = qkv.reshape(bt, n, 3 * inner)

    def heads_leading(base):
        # (bt, n, dh) lane slices stacked along a leading group axis (no transpose).
        return jnp.concatenate(
            [qkv[:, :, base + h * dim_head: base + (h + 1) * dim_head]
             for h in range(heads)], axis=0)                     # (heads*bt, n, dh)

    q = heads_leading(0)                 # scale already folded into W_q at pack time
    k = heads_leading(inner)
    v = heads_leading(2 * inner)

    dots = jnp.einsum('gnk,gmk->gnm', q.astype(cd), k.astype(cd),
                      preferred_element_type=jnp.float32)        # (heads*bt, n, n)
    dots = dots - jnp.max(dots, axis=-1, keepdims=True)
    e = jnp.exp(dots)
    attn = e * pl.reciprocal(jnp.sum(e, axis=-1, keepdims=True), approx=True)

    ov = jnp.einsum('gnm,gmk->gnk', attn.astype(cd), v.astype(cd),
                    preferred_element_type=jnp.float32)          # (heads*bt, n, dh)
    # (heads*bt, n, dh) -> (rows, inner): leading-dim unstack + minor-dim concat.
    ov = jnp.concatenate([ov[h * bt:(h + 1) * bt] for h in range(heads)],
                         axis=-1).reshape(rows, inner)

    # Flat output projection: contracts the full inner dim; head-sum free in MXU acc.
    proj = jnp.dot(ov.astype(cd), wo_ref[0], preferred_element_type=jnp.float32)
    acc_ref[...] += proj + bout_ref[0]

    @pl.when(r == nr - 1)
    def _():
        o_ref[...] = acc_ref[...].reshape(bt, n, d).astype(o_ref.dtype)


def ff_kernel(x_ref, g_ref, b_ref, w1_ref, b1_ref, w2_ref, b2_ref, o_ref,
              xhat_ref, xn_ref, acc_ref):
    """Fused Parallel(feed-forward branches) + residual over a row block.

    grid = (row_blocks, branch, mlp_chunk); w1/w2 stream in (D,tk)/(tk,D)
    chunks, second matmul accumulates into acc_ref (seeded with the residual).
    """
    r = pl.program_id(1)
    k = pl.program_id(2)
    nr = pl.num_programs(1)
    nk = pl.num_programs(2)
    cd = w2_ref.dtype

    @pl.when(jnp.logical_and(r == 0, k == 0))
    def _():
        xf = x_ref[...].astype(jnp.float32)
        mean = jnp.mean(xf, axis=-1, keepdims=True)
        var = jnp.mean((xf - mean) ** 2, axis=-1, keepdims=True)
        xhat_ref[...] = (xf - mean) * jax.lax.rsqrt(var + 1e-5)
        acc_ref[...] = xf                                        # residual folded in

    @pl.when(k == 0)
    def _():
        xn_ref[...] = (xhat_ref[...] * g_ref[0] + b_ref[0]).astype(xn_ref.dtype)

    h = jnp.dot(xn_ref[...], w1_ref[0],
                preferred_element_type=jnp.float32) + b1_ref[0]   # (tm, tk)
    h = jax.nn.gelu(h, approximate=False)                         # exact erf GELU
    acc_ref[...] += jnp.dot(h.astype(cd), w2_ref[0],
                            preferred_element_type=jnp.float32)

    @pl.when(k == nk - 1)
    def _():
        acc_ref[...] += b2_ref[0]                                 # per-branch out bias

    @pl.when(jnp.logical_and(r == nr - 1, k == nk - 1))
    def _():
        o_ref[...] = acc_ref[...].astype(o_ref.dtype)


# ----------------------------- wrappers ------------------------------------

def _vmem_limit_bytes():
    # ~3/4 of physical VMEM: v5e/v6e 128 MiB -> 96 MiB, v7x 64 MiB -> 48 MiB.
    try:
        cap = pltpu.get_tpu_info().vmem_capacity_bytes
    except Exception:
        cap = 128 * 1024 * 1024
    return int(min(cap * 3 // 4, 100 * 1024 * 1024))


def _pick_batch_block(batch, target=4):
    """Largest divisor of batch <= target, keeping >=2 grid steps when possible
    (so the 'parallel' axis can shard across v7x's two TensorCores)."""
    bt = 1
    for c in range(1, min(batch, target) + 1):
        if batch % c == 0:
            bt = c
    if batch // bt < 2 and bt > 1:
        for c in range(bt - 1, 0, -1):
            if batch % c == 0:
                return c
    return bt


def _pick_row_tile(rows, cap=512):
    return rows if rows <= cap else cap          # ragged last block is fine (row-indep)


def _pick_tile(m, cap=1024):
    """Largest 128-aligned divisor of m that is <= cap (full m if m <= cap)."""
    if m <= cap:
        return m
    t = cap - cap % 128
    while t >= 128:
        if m % t == 0:
            return t
        t -= 128
    # TODO(synk): pad mlp_dim to a multiple of 128 and mask instead of untiled fallback.
    return m


def attention_parallel(x, pp, heads, dim_head):
    B, N, D = x.shape
    R = pp["wqkv"].shape[0]
    inner = heads * dim_head
    bt = _pick_batch_block(B)
    nb = B // bt
    wbytes = pp["wqkv"].dtype.itemsize
    kernel = functools.partial(attention_kernel, heads=heads, dim_head=dim_head)

    flops = 2 * B * R * (N * D * 3 * inner + 2 * heads * N * N * dim_head
                         + N * inner * D)
    trans = B * R * heads * N * N
    bytes_accessed = (2 * B * N * D * 4
                      + nb * R * (4 * D * inner * wbytes + 4 * D * 4))

    return pl.pallas_call(
        kernel,
        out_shape=jax.ShapeDtypeStruct((B, N, D), x.dtype),
        grid=(nb, R),
        in_specs=[
            pl.BlockSpec((bt, N, D), lambda b, r: (b, 0, 0)),
            pl.BlockSpec((1, 1, D), lambda b, r: (r, 0, 0)),
            pl.BlockSpec((1, 1, D), lambda b, r: (r, 0, 0)),
            pl.BlockSpec((1, D, 3 * inner), lambda b, r: (r, 0, 0)),
            pl.BlockSpec((1, inner, D), lambda b, r: (r, 0, 0)),
            pl.BlockSpec((1, 1, D), lambda b, r: (r, 0, 0)),
        ],
        out_specs=pl.BlockSpec((bt, N, D), lambda b, r: (b, 0, 0)),
        scratch_shapes=[pltpu.VMEM((bt * N, D), jnp.float32),
                        pltpu.VMEM((bt * N, D), jnp.float32)],
        compiler_params=pltpu.CompilerParams(
            dimension_semantics=("parallel", "arbitrary"),
            vmem_limit_bytes=_vmem_limit_bytes()),
        cost_estimate=pl.CostEstimate(flops=int(flops), transcendentals=int(trans),
                                      bytes_accessed=int(bytes_accessed)),
    )(x, pp["g"], pp["b"], pp["wqkv"], pp["wo"], pp["bout"])


def feedforward_parallel(x, pp):
    B, N, D = x.shape
    R, _, M = pp["w1"].shape
    rows = B * N
    tm = _pick_row_tile(rows)
    tk = _pick_tile(M)
    nrows = (rows + tm - 1) // tm
    nk = (M + tk - 1) // tk
    wbytes = pp["w1"].dtype.itemsize

    flops = 4 * B * R * N * D * M
    trans = B * R * N * M
    bytes_accessed = (2 * rows * D * 4
                      + nrows * R * (2 * D * M * wbytes + (M + 3 * D) * 4))

    x2 = x.reshape(rows, D)
    out = pl.pallas_call(
        ff_kernel,
        out_shape=jax.ShapeDtypeStruct((rows, D), x.dtype),
        grid=(nrows, R, nk),
        in_specs=[
            pl.BlockSpec((tm, D), lambda i, r, k: (i, 0)),
            pl.BlockSpec((1, 1, D), lambda i, r, k: (r, 0, 0)),
            pl.BlockSpec((1, 1, D), lambda i, r, k: (r, 0, 0)),
            pl.BlockSpec((1, D, tk), lambda i, r, k: (r, 0, k)),
            pl.BlockSpec((1, 1, tk), lambda i, r, k: (r, 0, k)),
            pl.BlockSpec((1, tk, D), lambda i, r, k: (r, k, 0)),
            pl.BlockSpec((1, 1, D), lambda i, r, k: (r, 0, 0)),
        ],
        out_specs=pl.BlockSpec((tm, D), lambda i, r, k: (i, 0)),
        scratch_shapes=[pltpu.VMEM((tm, D), jnp.float32),
                        pltpu.VMEM((tm, D), pp["w1"].dtype),
                        pltpu.VMEM((tm, D), jnp.float32)],
        compiler_params=pltpu.CompilerParams(
            dimension_semantics=("parallel", "arbitrary", "arbitrary"),
            vmem_limit_bytes=_vmem_limit_bytes()),
        cost_estimate=pl.CostEstimate(flops=int(flops), transcendentals=int(trans),
                                      bytes_accessed=int(bytes_accessed)),
    )(x2, pp["g"], pp["b"], pp["w1"], pp["b1"], pp["w2"], pp["b2"])
    return out.reshape(B, N, D)


def transformer_forward(x, packed_layers, heads, dim_head):
    """Matches Transformer.forward: x = sum(attn_i(x)) + x ; x = sum(ff_i(x)) + x
    (branch sum + residual fused inside the kernels)."""
    for attn_pp, ff_pp in packed_layers:
        x = attention_parallel(x, attn_pp, heads, dim_head)
        x = feedforward_parallel(x, ff_pp)
    return x


# ----------------------------- parameter packing ----------------------------

def pack_attn_params(branches, heads, dim_head, compute_dtype=jnp.bfloat16):
    """Stack branch params; fold softmax scale into W_q; cast weights to bf16."""
    inner = heads * dim_head
    scale = dim_head ** -0.5
    wqkv_l, wo_l = [], []
    for p in branches:
        w = p["wqkv"].astype(jnp.float32)
        w = w.at[:, :inner].multiply(scale)        # fold scale BEFORE low-prec cast
        wqkv_l.append(w.astype(compute_dtype))     # (D, 3*inner), head-major columns
        wo_l.append(p["wout"].astype(compute_dtype))   # (inner, D)
    return dict(
        g=jnp.stack([p["ln_g"] for p in branches]),    # (R, 1, D) f32
        b=jnp.stack([p["ln_b"] for p in branches]),
        wqkv=jnp.stack(wqkv_l),                        # (R, D, 3*inner)
        wo=jnp.stack(wo_l),                            # (R, inner, D)
        bout=jnp.stack([p["bout"] for p in branches]),  # (R, 1, D) f32
    )


def pack_ff_params(branches, compute_dtype=jnp.bfloat16):
    return dict(
        g=jnp.stack([p["ln_g"] for p in branches]),                       # (R, 1, D)
        b=jnp.stack([p["ln_b"] for p in branches]),
        w1=jnp.stack([p["w1"].astype(compute_dtype) for p in branches]),  # (R, D, M)
        b1=jnp.stack([p["b1"] for p in branches]),                        # (R, 1, M)
        w2=jnp.stack([p["w2"].astype(compute_dtype) for p in branches]),  # (R, M, D)
        b2=jnp.stack([p["b2"] for p in branches]),                        # (R, 1, D)
    )


# ----------------------------- parameters ----------------------------------

def _uniform(key, shape, bound):
    return jax.random.uniform(key, shape, jnp.float32, -bound, bound)


def init_params(key, dim, depth, heads, dim_head, mlp_dim, num_branches):
    inner = heads * dim_head
    layers = []
    for _ in range(depth):
        attn_branches = []
        for _ in range(num_branches):
            key, k1, k2, k3 = jax.random.split(key, 4)
            attn_branches.append(dict(
                ln_g=jnp.ones((1, dim), jnp.float32),
                ln_b=jnp.zeros((1, dim), jnp.float32),
                wqkv=_uniform(k1, (dim, 3 * inner), dim ** -0.5),
                wout=_uniform(k2, (inner, dim), inner ** -0.5),
                bout=_uniform(k3, (1, dim), inner ** -0.5),
            ))
        ff_branches = []
        for _ in range(num_branches):
            key, k1, k2, k3, k4 = jax.random.split(key, 5)
            ff_branches.append(dict(
                ln_g=jnp.ones((1, dim), jnp.float32),
                ln_b=jnp.zeros((1, dim), jnp.float32),
                w1=_uniform(k1, (dim, mlp_dim), dim ** -0.5),
                b1=_uniform(k2, (1, mlp_dim), dim ** -0.5),
                w2=_uniform(k3, (mlp_dim, dim), mlp_dim ** -0.5),
                b2=_uniform(k4, (1, dim), mlp_dim ** -0.5),
            ))
        layers.append((attn_branches, ff_branches))
    return layers


# ----------------------------- pure-JAX reference ---------------------------

def _ref_ln(x, g, b, eps=1e-5):
    m = jnp.mean(x, axis=-1, keepdims=True)
    v = jnp.mean((x - m) ** 2, axis=-1, keepdims=True)
    return (x - m) / jnp.sqrt(v + eps) * g + b


def _ref_attn(x, p, heads, dim_head):
    B, N, D = x.shape
    inner = heads * dim_head
    xn = _ref_ln(x, p["ln_g"], p["ln_b"])
    qkv = xn @ p["wqkv"]
    q, k, v = jnp.split(qkv, 3, axis=-1)
    def to_heads(t):
        return t.reshape(B, N, heads, dim_head).transpose(0, 2, 1, 3)
    q, k, v = map(to_heads, (q, k, v))
    dots = jnp.einsum("bhnd,bhmd->bhnm", q, k) * (dim_head ** -0.5)
    attn = jax.nn.softmax(dots, axis=-1)
    out = jnp.einsum("bhnm,bhmd->bhnd", attn, v)
    out = out.transpose(0, 2, 1, 3).reshape(B, N, inner)
    return out @ p["wout"] + p["bout"]


def _ref_ff(x, p):
    xn = _ref_ln(x, p["ln_g"], p["ln_b"])
    h = jax.nn.gelu(xn @ p["w1"] + p["b1"], approximate=False)
    return h @ p["w2"] + p["b2"]


def ref_forward(x, layers, heads, dim_head):
    for attn_ps, ff_ps in layers:
        x = sum(_ref_attn(x, p, heads, dim_head) for p in attn_ps) + x
        x = sum(_ref_ff(x, p) for p in ff_ps) + x
    return x


# ----------------------------- main -----------------------------------------

if __name__ == "__main__":
    B, N, dim = 2, 8, 32
    heads, dim_head, mlp_dim = 4, 8, 64
    depth, num_parallel_branches = 2, 2

    key = jax.random.PRNGKey(0)
    key, xk = jax.random.split(key)
    x = jax.random.normal(xk, (B, N, dim), jnp.float32)
    layers = init_params(key, dim, depth, heads, dim_head, mlp_dim,
                         num_parallel_branches)
    ref = ref_forward(x, layers, heads, dim_head)

    # 1) f32 compute path: tight check of the kernel logic.
    packed32 = [(pack_attn_params(a, heads, dim_head, jnp.float32),
                 pack_ff_params(f, jnp.float32)) for a, f in layers]
    out32 = jax.block_until_ready(transformer_forward(x, packed32, heads, dim_head))
    assert out32.shape == (B, N, dim)
    err32 = float(jnp.max(jnp.abs(out32 - ref)))
    assert jnp.allclose(out32, ref, atol=5e-3, rtol=5e-3), f"f32 max_err={err32}"

    # 2) bf16 compute path (production default): looser numerical check.
    packed16 = [(pack_attn_params(a, heads, dim_head, jnp.bfloat16),
                 pack_ff_params(f, jnp.bfloat16)) for a, f in layers]
    out16 = jax.block_until_ready(transformer_forward(x, packed16, heads, dim_head))
    err16 = float(jnp.max(jnp.abs(out16 - ref)))
    assert jnp.allclose(out16, ref, atol=8e-2, rtol=8e-2), f"bf16 max_err={err16}"

    print("KERNEL_OK")
</pallas_src>

<mosaic_0001>
module attributes {stable_mosaic.version = 11 : i64} {
  func.func @attention_kernel(%arg0: i32, %arg1: i32, %arg2: memref<1x8x32xf32, #tpu.memory_space<vmem>>, %arg3: memref<1x1x32xf32, #tpu.memory_space<vmem>>, %arg4: memref<1x1x32xf32, #tpu.memory_space<vmem>>, %arg5: memref<1x32x96xf32, #tpu.memory_space<vmem>>, %arg6: memref<1x32x32xf32, #tpu.memory_space<vmem>>, %arg7: memref<1x1x32xf32, #tpu.memory_space<vmem>>, %arg8: memref<1x8x32xf32, #tpu.memory_space<vmem>>, %arg9: memref<8x32xf32, #tpu.memory_space<vmem>>, %arg10: memref<8x32xf32, #tpu.memory_space<vmem>>) attributes {dimension_semantics = [#tpu.dimension_semantics<parallel>, #tpu.dimension_semantics<arbitrary>], iteration_bounds = array<i64: 2, 2>, scalar_prefetch = 0 : i64, scratch_operands = 2 : i64, tpu.core_type = #tpu.core_type<tc>, window_params = [{transform_indices = @transform_0, window_bounds = array<i64: 1, 8, 32>}, {transform_indices = @transform_1, window_bounds = array<i64: 1, 1, 32>}, {transform_indices = @transform_2, window_bounds = array<i64: 1, 1, 32>}, {transform_indices = @transform_3, window_bounds = array<i64: 1, 32, 96>}, {transform_indices = @transform_4, window_bounds = array<i64: 1, 32, 32>}, {transform_indices = @transform_5, window_bounds = array<i64: 1, 1, 32>}, {transform_indices = @transform_6, window_bounds = array<i64: 1, 8, 32>}]} {
    %c0_i32 = arith.constant 0 : i32
    %0 = arith.cmpi eq, %arg1, %c0_i32 : i32
    %1 = arith.extui %0 : i1 to i32
    %c0_i32_0 = arith.constant 0 : i32
    %2 = arith.cmpi ne, %1, %c0_i32_0 : i32
    scf.if %2 {
      %c0_27 = arith.constant 0 : index
      %c0_28 = arith.constant 0 : index
      %c0_29 = arith.constant 0 : index
      %62 = vector.load %arg2[%c0_27, %c0_28, %c0_29] : memref<1x8x32xf32, #tpu.memory_space<vmem>>, vector<1x8x32xf32>
      %63 = vector.shape_cast %62 : vector<1x8x32xf32> to vector<8x32xf32>
      %cst_30 = arith.constant dense<0.000000e+00> : vector<8xf32>
      %64 = vector.multi_reduction <add>, %63, %cst_30 [1] : vector<8x32xf32> to vector<8xf32>
      %65 = vector.shape_cast %64 : vector<8xf32> to vector<8x1xf32>
      %cst_31 = arith.constant 3.200000e+01 : f32
      %66 = vector.broadcast %cst_31 : f32 to vector<8x1xf32>
      %67 = arith.divf %65, %66 : vector<8x1xf32>
      %68 = vector.broadcast %67 : vector<8x1xf32> to vector<8x32xf32>
      %69 = arith.subf %63, %68 : vector<8x32xf32>
      %70 = arith.mulf %69, %69 : vector<8x32xf32>
      %cst_32 = arith.constant dense<0.000000e+00> : vector<8xf32>
      %71 = vector.multi_reduction <add>, %70, %cst_32 [1] : vector<8x32xf32> to vector<8xf32>
      %72 = vector.shape_cast %71 : vector<8xf32> to vector<8x1xf32>
      %cst_33 = arith.constant 3.200000e+01 : f32
      %73 = vector.broadcast %cst_33 : f32 to vector<8x1xf32>
      %74 = arith.divf %72, %73 : vector<8x1xf32>
      %75 = vector.broadcast %67 : vector<8x1xf32> to vector<8x32xf32>
      %76 = arith.subf %63, %75 : vector<8x32xf32>
      %cst_34 = arith.constant 9.99999974E-6 : f32
      %77 = vector.broadcast %cst_34 : f32 to vector<8x1xf32>
      %78 = arith.addf %74, %77 : vector<8x1xf32>
      %79 = math.rsqrt %78 : vector<8x1xf32>
      %80 = vector.broadcast %79 : vector<8x1xf32> to vector<8x32xf32>
      %81 = arith.mulf %76, %80 : vector<8x32xf32>
      %c0_35 = arith.constant 0 : index
      %c0_36 = arith.constant 0 : index
      %82 = vector.load %arg9[%c0_35, %c0_36] : memref<8x32xf32, #tpu.memory_space<vmem>>, vector<8x32xf32>
      tpu.vector_store %arg9[%c0_35, %c0_36], %81 {strides = array<i32>} : memref<8x32xf32, #tpu.memory_space<vmem>>, vector<8x32xf32>,
      %c0_37 = arith.constant 0 : index
      %c0_38 = arith.constant 0 : index
      %83 = vector.load %arg10[%c0_37, %c0_38] : memref<8x32xf32, #tpu.memory_space<vmem>>, vector<8x32xf32>
      tpu.vector_store %arg10[%c0_37, %c0_38], %63 {strides = array<i32>} : memref<8x32xf32, #tpu.memory_space<vmem>>, vector<8x32xf32>,
    } else {
    }
    %c0 = arith.constant 0 : index
    %c0_1 = arith.constant 0 : index
    %3 = vector.load %arg9[%c0, %c0_1] : memref<8x32xf32, #tpu.memory_space<vmem>>, vector<8x32xf32>
    %c0_2 = arith.constant 0 : index
    %c0_3 = arith.constant 0 : index
    %c0_4 = arith.constant 0 : index
    %4 = vector.load %arg3[%c0_2, %c0_3, %c0_4] : memref<1x1x32xf32, #tpu.memory_space<vmem>>, vector<1x1x32xf32>
    %5 = vector.shape_cast %4 : vector<1x1x32xf32> to vector<1x32xf32>
    %6 = vector.broadcast %5 : vector<1x32xf32> to vector<8x32xf32>
    %7 = arith.mulf %3, %6 : vector<8x32xf32>
    %c0_5 = arith.constant 0 : index
    %c0_6 = arith.constant 0 : index
    %c0_7 = arith.constant 0 : index
    %8 = vector.load %arg4[%c0_5, %c0_6, %c0_7] : memref<1x1x32xf32, #tpu.memory_space<vmem>>, vector<1x1x32xf32>
    %9 = vector.shape_cast %8 : vector<1x1x32xf32> to vector<1x32xf32>
    %10 = vector.broadcast %9 : vector<1x32xf32> to vector<8x32xf32>
    %11 = arith.addf %7, %10 : vector<8x32xf32>
    %c0_8 = arith.constant 0 : index
    %c0_9 = arith.constant 0 : index
    %c0_10 = arith.constant 0 : index
    %12 = vector.load %arg5[%c0_8, %c0_9, %c0_10] : memref<1x32x96xf32, #tpu.memory_space<vmem>>, vector<1x32x96xf32>
    %13 = vector.shape_cast %12 : vector<1x32x96xf32> to vector<32x96xf32>
    %cst = arith.constant dense<0.000000e+00> : vector<8x96xf32>
    %14 = tpu.matmul %11, %13, %cst {dimension_numbers = #tpu.dot_dimension_numbers<[1], [0], [0], [1], [0, 0, 1, 1], [], []>} : vector<8x32xf32>, vector<32x96xf32>, vector<8x96xf32> -> vector<8x96xf32>
    %15 = vector.shape_cast %14 : vector<8x96xf32> to vector<1x8x96xf32>
    %16 = vector.extract_strided_slice %15 {offsets = [0, 0, 0], sizes = [1, 8, 8], strides = [1, 1, 1]} : vector<1x8x96xf32> to vector<1x8x8xf32>
    %17 = vector.extract_strided_slice %15 {offsets = [0, 0, 8], sizes = [1, 8, 8], strides = [1, 1, 1]} : vector<1x8x96xf32> to vector<1x8x8xf32>
    %18 = vector.extract_strided_slice %15 {offsets = [0, 0, 16], sizes = [1, 8, 8], strides = [1, 1, 1]} : vector<1x8x96xf32> to vector<1x8x8xf32>
    %19 = vector.extract_strided_slice %15 {offsets = [0, 0, 24], sizes = [1, 8, 8], strides = [1, 1, 1]} : vector<1x8x96xf32> to vector<1x8x8xf32>
    %20 = tpu.concatenate %16, %17, %18, %19 in 0 : vector<1x8x8xf32>, vector<1x8x8xf32>, vector<1x8x8xf32>, vector<1x8x8xf32> -> vector<4x8x8xf32>
    %21 = vector.extract_strided_slice %15 {offsets = [0, 0, 32], sizes = [1, 8, 8], strides = [1, 1, 1]} : vector<1x8x96xf32> to vector<1x8x8xf32>
    %22 = vector.extract_strided_slice %15 {offsets = [0, 0, 40], sizes = [1, 8, 8], strides = [1, 1, 1]} : vector<1x8x96xf32> to vector<1x8x8xf32>
    %23 = vector.extract_strided_slice %15 {offsets = [0, 0, 48], sizes = [1, 8, 8], strides = [1, 1, 1]} : vector<1x8x96xf32> to vector<1x8x8xf32>
    %24 = vector.extract_strided_slice %15 {offsets = [0, 0, 56], sizes = [1, 8, 8], strides = [1, 1, 1]} : vector<1x8x96xf32> to vector<1x8x8xf32>
    %25 = tpu.concatenate %21, %22, %23, %24 in 0 : vector<1x8x8xf32>, vector<1x8x8xf32>, vector<1x8x8xf32>, vector<1x8x8xf32> -> vector<4x8x8xf32>
    %26 = vector.extract_strided_slice %15 {offsets = [0, 0, 64], sizes = [1, 8, 8], strides = [1, 1, 1]} : vector<1x8x96xf32> to vector<1x8x8xf32>
    %27 = vector.extract_strided_slice %15 {offsets = [0, 0, 72], sizes = [1, 8, 8], strides = [1, 1, 1]} : vector<1x8x96xf32> to vector<1x8x8xf32>
    %28 = vector.extract_strided_slice %15 {offsets = [0, 0, 80], sizes = [1, 8, 8], strides = [1, 1, 1]} : vector<1x8x96xf32> to vector<1x8x8xf32>
    %29 = vector.extract_strided_slice %15 {offsets = [0, 0, 88], sizes = [1, 8, 8], strides = [1, 1, 1]} : vector<1x8x96xf32> to vector<1x8x8xf32>
    %30 = tpu.concatenate %26, %27, %28, %29 in 0 : vector<1x8x8xf32>, vector<1x8x8xf32>, vector<1x8x8xf32>, vector<1x8x8xf32> -> vector<4x8x8xf32>
    "tpu.trace_start"() <{level = 10 : i32, message = "gnk,gmk->gnm"}> : () -> ()
    %cst_11 = arith.constant dense<0.000000e+00> : vector<4x8x8xf32>
    %31 = tpu.matmul %20, %25, %cst_11 {dimension_numbers = #tpu.dot_dimension_numbers<[2], [2], [1], [1], [0, 0, 0, 1, 1, 1], [0], [0]>} : vector<4x8x8xf32>, vector<4x8x8xf32>, vector<4x8x8xf32> -> vector<4x8x8xf32>
    "tpu.trace_stop"() : () -> ()
    %cst_12 = arith.constant dense<0xFF800000> : vector<4x8xf32>
    %32 = vector.multi_reduction <maximumf>, %31, %cst_12 [2] : vector<4x8x8xf32> to vector<4x8xf32>
    %33 = vector.shape_cast %32 : vector<4x8xf32> to vector<4x8x1xf32>
    %34 = vector.broadcast %33 : vector<4x8x1xf32> to vector<4x8x8xf32>
    %35 = arith.subf %31, %34 : vector<4x8x8xf32>
    %36 = math.exp %35 : vector<4x8x8xf32>
    %cst_13 = arith.constant dense<0.000000e+00> : vector<4x8xf32>
    %37 = vector.multi_reduction <add>, %36, %cst_13 [2] : vector<4x8x8xf32> to vector<4x8xf32>
    %38 = vector.shape_cast %37 : vector<4x8xf32> to vector<4x8x1xf32>
    %39 = tpu.reciprocal %38 {approx = true} : vector<4x8x1xf32> -> vector<4x8x1xf32>
    %40 = vector.broadcast %39 : vector<4x8x1xf32> to vector<4x8x8xf32>
    %41 = arith.mulf %36, %40 : vector<4x8x8xf32>
    "tpu.trace_start"() <{level = 10 : i32, message = "gnm,gmk->gnk"}> : () -> ()
    %cst_14 = arith.constant dense<0.000000e+00> : vector<4x8x8xf32>
    %42 = tpu.matmul %41, %30, %cst_14 {dimension_numbers = #tpu.dot_dimension_numbers<[2], [1], [1], [2], [0, 0, 0, 1, 1, 2], [0], [0]>} : vector<4x8x8xf32>, vector<4x8x8xf32>, vector<4x8x8xf32> -> vector<4x8x8xf32>
    "tpu.trace_stop"() : () -> ()
    %43 = vector.extract_strided_slice %42 {offsets = [0, 0, 0], sizes = [1, 8, 8], strides = [1, 1, 1]} : vector<4x8x8xf32> to vector<1x8x8xf32>
    %44 = vector.extract_strided_slice %42 {offsets = [1, 0, 0], sizes = [1, 8, 8], strides = [1, 1, 1]} : vector<4x8x8xf32> to vector<1x8x8xf32>
    %45 = vector.extract_strided_slice %42 {offsets = [2, 0, 0], sizes = [1, 8, 8], strides = [1, 1, 1]} : vector<4x8x8xf32> to vector<1x8x8xf32>
    %46 = vector.extract_strided_slice %42 {offsets = [3, 0, 0], sizes = [1, 8, 8], strides = [1, 1, 1]} : vector<4x8x8xf32> to vector<1x8x8xf32>
    %47 = tpu.concatenate %43, %44, %45, %46 in 2 : vector<1x8x8xf32>, vector<1x8x8xf32>, vector<1x8x8xf32>, vector<1x8x8xf32> -> vector<1x8x32xf32>
    %48 = vector.shape_cast %47 : vector<1x8x32xf32> to vector<8x32xf32>
    %c0_15 = arith.constant 0 : index
    %c0_16 = arith.constant 0 : index
    %c0_17 = arith.constant 0 : index
    %49 = vector.load %arg6[%c0_15, %c0_16, %c0_17] : memref<1x32x32xf32, #tpu.memory_space<vmem>>, vector<1x32x32xf32>
    %50 = vector.shape_cast %49 : vector<1x32x32xf32> to vector<32x32xf32>
    %cst_18 = arith.constant dense<0.000000e+00> : vector<8x32xf32>
    %51 = tpu.matmul %48, %50, %cst_18 {dimension_numbers = #tpu.dot_dimension_numbers<[1], [0], [0], [1], [0, 0, 1, 1], [], []>} : vector<8x32xf32>, vector<32x32xf32>, vector<8x32xf32> -> vector<8x32xf32>
    %c0_19 = arith.constant 0 : index
    %c0_20 = arith.constant 0 : index
    %52 = vector.load %arg10[%c0_19, %c0_20] : memref<8x32xf32, #tpu.memory_space<vmem>>, vector<8x32xf32>
    %c0_21 = arith.constant 0 : index
    %c0_22 = arith.constant 0 : index
    %c0_23 = arith.constant 0 : index
    %53 = vector.load %arg7[%c0_21, %c0_22, %c0_23] : memref<1x1x32xf32, #tpu.memory_space<vmem>>, vector<1x1x32xf32>
    %54 = vector.shape_cast %53 : vector<1x1x32xf32> to vector<1x32xf32>
    %55 = vector.broadcast %54 : vector<1x32xf32> to vector<8x32xf32>
    %56 = arith.addf %51, %55 : vector<8x32xf32>
    %57 = arith.addf %52, %56 : vector<8x32xf32>
    %c0_24 = arith.constant 0 : index
    %c0_25 = arith.constant 0 : index
    %58 = vector.load %arg10[%c0_24, %c0_25] : memref<8x32xf32, #tpu.memory_space<vmem>>, vector<8x32xf32>
    tpu.vector_store %arg10[%c0_24, %c0_25], %57 {strides = array<i32>} : memref<8x32xf32, #tpu.memory_space<vmem>>, vector<8x32xf32>,
    %c1_i32 = arith.constant 1 : i32
    %59 = arith.cmpi eq, %arg1, %c1_i32 : i32
    %60 = arith.extui %59 : i1 to i32
    %c0_i32_26 = arith.constant 0 : i32
    %61 = arith.cmpi ne, %60, %c0_i32_26 : i32
    scf.if %61 {
      %c0_27 = arith.constant 0 : index
      %c0_28 = arith.constant 0 : index
      %62 = vector.load %arg10[%c0_27, %c0_28] : memref<8x32xf32, #tpu.memory_space<vmem>>, vector<8x32xf32>
      %63 = vector.shape_cast %62 : vector<8x32xf32> to vector<1x8x32xf32>
      %c0_29 = arith.constant 0 : index
      %c0_30 = arith.constant 0 : index
      %c0_31 = arith.constant 0 : index
      %64 = vector.load %arg8[%c0_29, %c0_30, %c0_31] : memref<1x8x32xf32, #tpu.memory_space<vmem>>, vector<1x8x32xf32>
      tpu.vector_store %arg8[%c0_29, %c0_30, %c0_31], %63 {strides = array<i32>} : memref<1x8x32xf32, #tpu.memory_space<vmem>>, vector<1x8x32xf32>,
    } else {
    }
    return
  }
  func.func @transform_0(%arg0: i32, %arg1: i32) -> (i32, i32, i32) {
    %c0_i32 = arith.constant 0 : i32
    %c0_i32_0 = arith.constant 0 : i32
    %c0_i32_1 = arith.constant 0 : i32
    return %arg0, %c0_i32, %c0_i32_0 : i32, i32, i32
  }
  func.func @transform_1(%arg0: i32, %arg1: i32) -> (i32, i32, i32) {
    %c0_i32 = arith.constant 0 : i32
    %c0_i32_0 = arith.constant 0 : i32
    %c0_i32_1 = arith.constant 0 : i32
    return %arg1, %c0_i32, %c0_i32_0 : i32, i32, i32
  }
  func.func @transform_2(%arg0: i32, %arg1: i32) -> (i32, i32, i32) {
    %c0_i32 = arith.constant 0 : i32
    %c0_i32_0 = arith.constant 0 : i32
    %c0_i32_1 = arith.constant 0 : i32
    return %arg1, %c0_i32, %c0_i32_0 : i32, i32, i32
  }
  func.func @transform_3(%arg0: i32, %arg1: i32) -> (i32, i32, i32) {
    %c0_i32 = arith.constant 0 : i32
    %c0_i32_0 = arith.constant 0 : i32
    %c0_i32_1 = arith.constant 0 : i32
    return %arg1, %c0_i32, %c0_i32_0 : i32, i32, i32
  }
  func.func @transform_4(%arg0: i32, %arg1: i32) -> (i32, i32, i32) {
    %c0_i32 = arith.constant 0 : i32
    %c0_i32_0 = arith.constant 0 : i32
    %c0_i32_1 = arith.constant 0 : i32
    return %arg1, %c0_i32, %c0_i32_0 : i32, i32, i32
  }
  func.func @transform_5(%arg0: i32, %arg1: i32) -> (i32, i32, i32) {
    %c0_i32 = arith.constant 0 : i32
    %c0_i32_0 = arith.constant 0 : i32
    %c0_i32_1 = arith.constant 0 : i32
    return %arg1, %c0_i32, %c0_i32_0 : i32, i32, i32
  }
  func.func @transform_6(%arg0: i32, %arg1: i32) -> (i32, i32, i32) {
    %c0_i32 = arith.constant 0 : i32
    %c0_i32_0 = arith.constant 0 : i32
    %c0_i32_1 = arith.constant 0 : i32
    return %arg0, %c0_i32, %c0_i32_0 : i32, i32, i32
  }
}

</mosaic_0001>

<bundles_post_ra>
// kernel: tpu_custom_call.1
= control target key start
LH: loop header
LB: loop body
LE: loop exit
PB: predicated region body
PF: predicated region fallthrough
CT: control target
= control target key end

     0   :  { %s2462_s0 = inlined_call_operand.hbm [shape: f32[2,8,32], index: 0, kind: input, shape index: {}]   ;;  %s2463_s1 = inlined_call_operand.hbm [shape: f32[2,1,32], index: 1, kind: input, shape index: {}]   ;;  %s2464_s2 = inlined_call_operand.vmem [shape: f32[2,1,32], index: 2, kind: input, shape index: {}]   ;;  %s2465_s3 = inlined_call_operand.hbm [shape: f32[2,32,96], index: 3, kind: input, shape index: {}]   ;;  %s2466_s4 = inlined_call_operand.hbm [shape: f32[2,32,32], index: 4, kind: input, shape index: {}]   ;;  %s2467_s5 = inlined_call_operand.vmem [shape: f32[2,1,32], index: 5, kind: input, shape index: {}]   ;;  %s2468_s6 = inlined_call_operand.hbm [shape: f32[2,8,32], index: 6, kind: output, shape index: {}]  }
   0x1   :  { %2483 = sst [smem:[#allocation28_spill]] %s2463_s1 }
   0x2   :  { %2484 = sst [smem:[#allocation29_spill]] %s2464_s2 }
   0x3   :  { %2485 = sst [smem:[#allocation30_spill]] %s2467_s5 }
   0x4   :  { %2486 = sst [smem:[#allocation31_spill]] %s2468_s6 }
   0x5   :  { %11 = vsyncpa [#allocation5], 0 }
   0x6   :  { %13 = vsyncpa [#allocation5 + $0x1], 0 }
   0x7   :  { %14 = vsyncpa [#allocation8], 0 }
   0x8   :  { %16 = vsyncpa [#allocation8 + $0x1], 0 }
   0x9   :  { %17 = vsyncpa [#allocation11], 0 }
   0xa   :  { %19 = vsyncpa [#allocation11 + $0x1], 0 }
   0xb   :  { %20 = vsyncpa [#allocation6], 0 }
   0xc   :  { %22 = vsyncpa [#allocation6 + $0x1], 0  ;;  %s2053_s21 = smov 0   ;;  %s2055_s22 = smov 0  }
   0xd   :  { %s2057_s23 = smov 0   ;;  %s2059_s24 = smov 0  }
   0xe   :  { %s2061_s25 = smov 0   ;;  %s2063_s26 = smov 0  }
   0xf   :  { %s2065_s27 = smov 0   ;;  %s2067_s28 = smov 0  }
  0x10   :  { %s2069_s29 = smov 0   ;;  %s2071_s30 = smov 0  }
  0x11   :  { %s2073_s7 = smov 0  }
  0x12 LB: > { %2487 = sst [smem:[#allocation17_spill]] %s1963_s22  ;;  %s2107_s8 = sadd.s32 4294967295, %s1999_s7   ;;  %s1999_s7 = sphi %s2073_s7, %s28_s7   ;;  %s1995_s30 = sphi %s2071_s30, %s2533_s30   ;;  %s1991_s29 = sphi %s2069_s29, %s2538_s29   ;;  %s1987_s28 = sphi %s2067_s28, %s2531_s28   ;;  %s1983_s27 = sphi %s2065_s27, %s2537_s27   ;;  %s1979_s26 = sphi %s2063_s26, %s2536_s26   ;;  %s1975_s25 = sphi %s2061_s25, %s2535_s25   ;;  %s1971_s24 = sphi %s2059_s24, %s2534_s24   ;;  %s1967_s23 = sphi %s2057_s23, %s2529_s23   ;;  %s1963_s22 = sphi %s2055_s22, %s2528_s22   ;;  %s1959_s21 = sphi %s2053_s21, %s2527_s21  }
  0x13   : > { %2488 = sst [smem:[#allocation18_spill]] %s1967_s23  ;;  %s37_s9 = sadd.s32 1, %s1991_s29 }
  0x14   : > { %2489 = sst [smem:[#allocation19_spill]] %s1971_s24  ;;  %p2110_p0 = scmp.ge.s32.totalorder %s37_s9, 2 }
  0x15   : > { %2490 = sst [smem:[#allocation20_spill]] %s1983_s27  ;;  %p55_p1 = scmp.eq.s32.totalorder %s1999_s7, 0 }
  0x16   : > { %2491 = sst [smem:[#allocation21_spill]] %s1987_s28  ;;  %p61_p2 = scmp.eq.s32.totalorder %s2107_s8, 0 }
  0x17   : > { %2492 = sst [smem:[#allocation22_spill]] %s1995_s30  ;;  %s73_s11 = sadd.s32 1, %s1967_s23 }
  0x18   : > { %s2540_s9 = smov (%p2110_p0, %s37_s9), 0  ;;  %p80_p3 = scmp.ne.s32.totalorder %s1967_s23, %s1963_s22 }
  0x19   : > { %2494 = sst [smem:[#allocation23_spill]] %s2540_s9  ;;  %p86_p4 = scmp.ne.s32.totalorder %s1963_s22, %s1959_s21 }
  0x1a   : > { %s70_s12 = ssub.s32 %s1991_s29, %s2540_s9  ;;  %p82_p6 = por %p80_p3, %p55_p1 }
  0x1b   : > { %p71_p5 = scmp.eq.s32.totalorder %s70_s12, 0  ;;  %p2130_p7 = por %p86_p4, %p61_p2 }
  0x1c   : > { %p2473_p8 = scmp.lt.s32.totalorder %s1999_s7, 4  ;;  %s258_s15 = sand.u32 1, %s1999_s7  }
  0x1d   : > { %s2495_s13 = scalar_select %p2130_p7, 1, 0 }
  0x1e   : > { %s2136_s14 = scalar_select %p71_p5, %s1967_s23, %s73_s11  }
  0x1f   : > { %2496 = sst [smem:[#allocation24_spill]] %s2495_s13  ;;  %s2140_s16 = sand.u32 1, %s1967_s23  }
  0x20   : > { %2497 = sst [smem:[#allocation25_spill]] %s2136_s14  ;;  %s1487_s17 = sshll.u32 %s1991_s29, 4 }
  0x21   : > { %s261_s18 = scalar_lea.vmem [#allocation7], %s2140_s16  ;;  %s2498_s1 = sld [smem:[#allocation28_spill]] }
  0x22   : > { %s268_s19 = sshll.u32 %s261_s18, 4  ;;  %p2149_p9 = pnand %p2473_p8, %p82_p6  ;;  %s269_s19 = int_to_ptr.vmem [resolvable:$true] %s268_s19 }
  0x23   : > { %s2474_s11 = sshll.u32 %s2140_s16, 5  ;;  %s2157_s28 = scalar_lea.sflag [#allocation8], %s258_s15 }
  0x24   : > { %s285_s23 = scalar_lea.vmem [#allocation9], %s2474_s11  ;;  %p2472_p10 = pneg %p2149_p9 }
  0x25   : > { %s292_s6 = sshll.u32 %s285_s23, 4  ;;  %s1772_s18 = scalar_lea.vmem %s269_s19, 16  ;;  %s2167_s6 = int_to_ptr.vmem [resolvable:$true] %s292_s6 }
  0x26   : > { %p1773_p11 = scmp.ne.s32.totalorder %s269_s19, %s1772_s18 }
  0x27   : > { %s266_s12 = scalar_lea.hbm %s2498_s1, %s1487_s17  ;;  %s2001_s17 = smov [#allocation7]  }
  0x28   : > { %p1775_p12 = pnand %p1773_p11, %p2472_p10  ;;  %s1777_s20 = sshll.u32 %s2001_s17, 4  ;;  %s1778_s20 = int_to_ptr.vmem [resolvable:$false] %s1777_s20 }
  0x29   : > { %s1779_s21 = scalar_lea.vmem %s1778_s20, 32  ;;  %p1780_p3 = scmp.lt.s32.totalorder %s269_s19, %s1778_s20 }
  0x2a   : > { %p1776_p13 = pneg %p1775_p12  ;;  %p1781_p4 = scmp.lt.s32.totalorder %s1779_s21, %s1772_s18 }
  0x2c   : > { %p1782_p5 = por %p1781_p4, %p1780_p3 }
  0x2e   : > { %p1783_p6 = pnand %p1782_p5, %p1776_p13 }
  0x30   : > { %1786 = shalt.err (!%p1783_p6)
}
  0x31   : > { %1628 = dma.hbm_to_vmem [thread:$0]  (!%p2149_p9), %s266_s12, 16, %s269_s19, %s2157_s28  }
  0x32   : > { %p1494_p11 = scmp.ge.s32.totalorder %s1999_s7, 1  ;;  %p327_p12 = scmp.lt.s32.totalorder %s1999_s7, 5 }
  0x33   : > { %s1482_s15 = sadd.s32 4294967294, %s1999_s7   ;;  %s40_s18 = sadd.s32 1, %s1995_s30 }
  0x34   : > { %p2171_p13 = pnand %p1494_p11, %p327_p12  ;;  %s2542_s18 = smov (!%p2110_p0, %s40_s18), %s1995_s30 }
  0x35   : > { %s47_s17 = sadd.s32 1, %s1979_s26  ;;  %p54_p3 = scmp.ne.s32.totalorder %s1979_s26, %s1975_s25 }
  0x36   : > { %p42_p4 = scmp.ge.s32.totalorder %s2542_s18, 2  ;;  %p60_p5 = scmp.ne.s32.totalorder %s1975_s25, %s1971_s24 }
  0x37   : > { %p2187_p6 = por %p55_p1, %p54_p3  ;;  %p214_p11 = scmp.eq.s32.totalorder %s2107_s8, 3 }
  0x38   : > { %s2544_s18 = smov (%p42_p4, %s2542_s18), 0  ;;  %p2196_p12 = por %p61_p2, %p60_p5 }
  0x39   : > { %2502 = sst [smem:[#allocation26_spill]] %s2544_s18  ;;  %p2200_p0 = por %p214_p11, %p54_p3 }
  0x3a   : > { %s44_s20 = ssub.s32 %s1995_s30, %s2544_s18  ;;  %p220_p1 = scmp.eq.s32.totalorder %s1482_s15, 3 }
  0x3b   : > { %s2504_s12 = scalar_select %p2200_p0, 1, 0 }
  0x3c   : > { %p45_p10 = scmp.eq.s32.totalorder %s44_s20, 0  ;;  %s240_s21 = sand.u32 1, %s1979_s26  }
  0x3d   : > { %p2207_p8 = por %p220_p1, %p60_p5  ;;  %s1485_s1 = sshll.u32 %s240_s21, 3 }
  0x3e   : > { %s2212_s14 = scalar_select %p45_p10, %s1979_s26, %s47_s17  }
  0x3f   : > { %s2505_s11 = scalar_select %p2207_p8, 1, 0 }
  0x40   : > { %2506 = sst [smem:[#allocation27_spill]] %s2212_s14  ;;  %s1486_s24 = sshll.u32 %s1995_s30, 7 }
  0x41   : > { %s249_s27 = scalar_lea.hbm %s2462_s0, %s1486_s24  ;;  %s244_s13 = scalar_lea.vmem [#allocation4], %s1485_s1 }
  0x42   : > { %s251_s22 = sshll.u32 %s244_s13, 4  ;;  %p2507_p2 = scmp.lt.s32.totalorder %s1999_s7, 4  ;;  %s252_s22 = int_to_ptr.vmem [resolvable:$true] %s251_s22 }
  0x43   : > { %s2509_s20 = sshll.u32 %s1991_s29, 9  ;;  %s241_s30 = scalar_lea.sflag [#allocation5], %s240_s21 }
  0x44   : > { %p2222_p3 = pnand %p2507_p2, %p2187_p6  ;;  %s2231_s14 = scalar_lea.hbm %s2465_s3, %s2509_s20 }
  0x45   : > { %s1800_s2 = scalar_lea.vmem %s252_s22, 128  ;;  %s2002_s1 = smov [#allocation4]  }
  0x46   : > { %p1789_p10 = pneg %p2222_p3  ;;  %p1801_p4 = scmp.ne.s32.totalorder %s252_s22, %s1800_s2 }
  0x47   : > { %s1805_s5 = sshll.u32 %s2002_s1, 4  ;;  %s1806_s5 = int_to_ptr.vmem [resolvable:$false] %s1805_s5 }
  0x48   : > { %p1803_p5 = pnand %p1801_p4, %p1789_p10  ;;  %s1807_s24 = scalar_lea.vmem %s1806_s5, 256 }
  0x49   : > { %p1808_p6 = scmp.lt.s32.totalorder %s252_s22, %s1806_s5  ;;  %p1809_p1 = scmp.lt.s32.totalorder %s1807_s24, %s1800_s2 }
  0x4a   : > { %p1804_p11 = pneg %p1803_p5 }
  0x4b   : > { %p1810_p2 = por %p1809_p1, %p1808_p6 }
  0x4d   : > { %p1811_p8 = pnand %p1810_p2, %p1804_p11 }
  0x4f   : > { %1814 = shalt.err (!%p1811_p8)
}
  0x50   : > { %1625 = dma.hbm_to_vmem [thread:$0]  (!%p2222_p3), %s249_s27, 128, %s252_s22, %s241_s30  }
  0x51   : > { %s1828_s13 = scalar_lea.vmem %s2167_s6, 512  ;;  %p2510_p10 = pneg %p2149_p9 }
  0x52   : > { %p1829_p0 = scmp.ne.s32.totalorder %s2167_s6, %s1828_s13  ;;  %s2003_s18 = smov [#allocation9]  }
  0x53   : > { %s1833_s19 = sshll.u32 %s2003_s18, 4  ;;  %s1834_s19 = int_to_ptr.vmem [resolvable:$false] %s1833_s19 }
  0x54   : > { %p1831_p4 = pnand %p1829_p0, %p2510_p10  ;;  %s1835_s21 = scalar_lea.vmem %s1834_s19, 1024 }
  0x55   : > { %p1836_p6 = scmp.lt.s32.totalorder %s2167_s6, %s1834_s19  ;;  %p1837_p11 = scmp.lt.s32.totalorder %s1835_s21, %s1828_s13 }
  0x56   : > { %p1832_p5 = pneg %p1831_p4 }
  0x57   : > { %p1838_p8 = por %p1837_p11, %p1836_p6 }
  0x59   : > { %p1839_p1 = pnand %p1838_p8, %p1832_p5 }
  0x5b   : > { %1842 = shalt.err (!%p1839_p1)
}
  0x5c   : > { %s2004_s15 = smov 128   ;;  %s2005_s22 = smov 8  }
  0x5d   : > { %1631 = dma.hbm_to_vmem [thread:$0]  (!%p2149_p9), %s2231_s14, 512, %s2167_s6, %s2157_s28, %s2004_s15, %s2004_s15, %s2005_s22  }
  0x5e   : > { %s2511_s27 = smov %s2509_s20  ;;  %s2512_s2 = sshll.u32 %s2140_s16, 5 }
  0x5f   : > { %s312_s17 = scalar_lea.hbm %s2466_s4, %s2511_s27  ;;  %s306_s1 = scalar_lea.vmem [#allocation10], %s2512_s2 }
  0x60   : > { %s313_s5 = sshll.u32 %s306_s1, 4  ;;  %s303_s24 = scalar_lea.sflag [#allocation11], %s2140_s16  ;;  %s314_s5 = int_to_ptr.vmem [resolvable:$true] %s313_s5 }
  0x61   : > { %s1856_s13 = scalar_lea.vmem %s314_s5, 512  ;;  %p2513_p3 = pmov %p2510_p10 }
  0x62   : > { %p1857_p0 = scmp.ne.s32.totalorder %s314_s5, %s1856_s13  ;;  %s2006_s18 = smov [#allocation10]  }
  0x63   : > { %s1861_s19 = sshll.u32 %s2006_s18, 4  ;;  %s1862_s19 = int_to_ptr.vmem [resolvable:$false] %s1861_s19 }
  0x64   : > { %p1859_p2 = pnand %p1857_p0, %p2513_p3  ;;  %s1863_s6 = scalar_lea.vmem %s1862_s19, 1024 }
  0x65   : > { %p1864_p4 = scmp.lt.s32.totalorder %s314_s5, %s1862_s19  ;;  %p1865_p5 = scmp.lt.s32.totalorder %s1863_s6, %s1856_s13 }
  0x66   : > { %p1860_p10 = pneg %p1859_p2 }
  0x67   : > { %p1866_p6 = por %p1865_p5, %p1864_p4 }
  0x69   : > { %p1867_p11 = pnand %p1866_p6, %p1860_p10 }
  0x6b   : > { %1870 = shalt.err (!%p1867_p11)
}
  0x6c   : > { %1634 = dma.hbm_to_vmem [thread:$0]  (!%p2149_p9), %s312_s17, 512, %s314_s5, %s303_s24, %s2004_s15, %s2004_s15, %s2005_s22  }
  0x6d   : > { %331 = sbr.rel (%p2171_p13) target bundleno = 1939 (0x793), region = 44  ;;  %s2264_s28 = sand.u32 (!%p2171_p13), 1, %s1975_s25  }
  0x6e   : > { %s1495_s14 = sshll.u32 (!%p2171_p13), %s2264_s28, 3  ;;  %s334_s16 = scalar_lea.sflag (!%p2171_p13), [#allocation5], %s2264_s28 }
  0x6f   : > { %s337_s21 = scalar_lea.vmem (!%p2171_p13), [#allocation4], %s1495_s14 }
  0x72   : > { %1942 = dma.done.wait (%p2196_p12), %s334_s16, 128  }
  0x73   : > { %1944 = vsyncadd (%p2196_p12), %s334_s16, 4294967168  ;;  %s2514_s9 = sld [smem:[#allocation17_spill]]  ;;  %s342_s22 = sand.u32 1, %s2107_s8  }
  0x74   : > { %s343_s27 = scalar_lea.sflag [#allocation8], %s342_s22 }
  0x79   : > { %s2274_s23 = sand.u32 1, %s2514_s9  }
  0x7a   : > { %s345_s30 = scalar_lea.vmem [#allocation7], %s2274_s23 }
  0x7b   : > { %1946 = dma.done.wait (%p2130_p7), %s343_s27, 528  }
  0x7c   : > { %1948 = vsyncadd (%p2130_p7), %s343_s27, 4294966768  ;;  %s1496_s20 = sshll.u32 %s2274_s23, 5  ;;  %s360_s17 = scalar_lea.sflag [#allocation11], %s2274_s23 }
  0x7d   : > { %s2282_s10 = scalar_lea.vmem [#allocation9], %s1496_s20  ;;  %s2285_s2 = scalar_lea.vmem [#allocation10], %s1496_s20 }
  0x7e   : > { %1950 = dma.done.wait (%p2130_p7), %s360_s17, 512  }
  0x7f   : > { %1952 = vsyncadd (%p2130_p7), %s360_s17, 4294966784  ;;  %s2516_s8 = sld [smem:[#allocation20_spill]]  ;;  %s2303_s22 = scalar_lea.vmem [#allocation12], %s1495_s14 }
  0x80   : > { %s2517_s13 = sld [smem:[#allocation29_spill]] }
  0x81   : > { %s2518_s16 = sld [smem:[#allocation30_spill]] }
  0x85   : > { %p412_p9 = scmp.lt.s32.totalorder %s2516_s8, 1  ;;  %p1499_p13 = scmp.ne.s32.totalorder %s2516_s8, 0 }
  0x87   : > { %s2293_s1 = scalar_select %p412_p9, %s2516_s8, 1 }
  0x88   : > { %421 = sbr.rel (%p1499_p13) target bundleno = 447 (0x1bf), region = 64 }
  0x89   : > { %s414_s18 = scalar_lea.vmem %s2517_s13, %s2293_s1  ;;  %s417_s9 = scalar_lea.vmem %s2518_s16, %s2293_s1 }
  0x8d   : > { %v422_v0 = vld [vmem:[%s337_s21] sm:$0xff]  ;;  %vm423_vm0 = vcmask 261120  }
  0x8e   : > { %v424_v1 = vsel %vm423_vm0, %v422_v0, 0.0  ;;  %439 = vst.msk [vmem:[#allocation3] sm:$0xff] %vm423_vm0, %v422_v0 }
  0x8f   : > { %425 = vadd.xlane.f32.xlu0 %v424_v1 }
 0x118   : > { %v426_v2 = vpop.xlane.xlu0 %425 }
 0x119   : > { %v428_v3 = vmul.f32 0.03125, %v426_v2 }
 0x11b   : > { %v429_v4 = vsub.f32 %v422_v0, %v428_v3 }
 0x11d   : > { %v430_v5 = vmul.f32 %v429_v4, %v429_v4 }
 0x11f   : > { %v431_v6 = vsel %vm423_vm0, %v430_v5, 0.0 }
 0x120   : > { %432 = vadd.xlane.f32.xlu0 %v431_v6 }
 0x1a9   : > { %v433_v7 = vpop.xlane.xlu0 %432 }
 0x1aa   : > { %v434_v8 = vmul.f32 0.03125, %v433_v7 }
 0x1ac   : > { %v435_v9 = vadd.f32 1e-05, %v434_v8 }
 0x1ae   : > { %1741 = vrsqrt.f32 %v435_v9 }
 0x1bb   : > { %v1742_v10 = vpop.eup %1741 }
 0x1bc   : > { %v437_v11 = vmul.f32 %v1742_v10, %v429_v4 }
 0x1be   : > { %438 = vst.msk [vmem:[#allocation2] sm:$0xff] %vm423_vm0, %v437_v11 }
 0x1bf PF: > { %v460_v12 = vld [vmem:[%s2282_s10 + $0x18] sm:$0xff]  ;;  %v2007_v13 = vmov 0.0   ;;  %v459_v14 = vld [vmem:[%s2282_s10 + $0x10] sm:$0xff]  ;;  %vm2008_vm1 = vmmov 0   ;;  %v458_v19 = vld [vmem:[%s2282_s10 + $0x8] sm:$0xff]  ;;  %vm461_vm2 = vcmask 261120  }
 0x1c0   : > { %1550 = vmatprep.subr.mxu0 %v2007_v13  ;;  %1558 = vmatprep.mubr.msk.f32.mxu0 %vm2008_vm1, %v2007_v13  ;;  %v1500_v16 = vld [vmem:[%s345_s30] ss:$0 sm:$0xff]  ;;  %v457_v20 = vld [vmem:[%s2282_s10] sm:$0xff]  ;;  %s2009_s23 = smov 104   ;;  %s2010_s27 = smov 120   ;;  %vm544_vm3 = vcmask 64512  }
 0x1c1   : > { %1551 = vmatpush3.msra.mxu0 %v460_v12  ;;  %v1501_v18 = vld [vmem:[%s414_s18] ss:$0 sm:$0xff]  ;;  %1561 = vmatprep.subr.mxu1 %v2007_v13  ;;  %s2011_s30 = smov 96   ;;  %s2012_s20 = smov 112   ;;  %vm1208_vm4 = vcmask 130048   ;;  %vm1210_vm5 = vcmask 195584  }
 0x1c2   : > { %1552 = vmatprep.subr.mxu0 %v2007_v13  ;;  %1563 = vmatprep.mubr.msk.f32.mxu1 %vm2008_vm1, %v2007_v13  ;;  %s2013_s10 = smov 64   ;;  %s2014_s17 = smov 8  }
 0x1c3   : > { %1553 = vmatpush3.msra.mxu0 %v459_v14  ;;  %s2015_s8 = smov 16   ;;  %s2016_s5 = smov 24  }
 0x1c4   : > { %1554 = vmatprep.subr.mxu0 %v2007_v13  ;;  %s2521_s18 = sld [smem:[#allocation20_spill]] }
 0x1c5   : > { %v440_v15 = vld [vmem:[#allocation2] sm:$0xff]  ;;  %1555 = vmatpush3.msra.mxu0 %v458_v19  ;;  %v1214_v19 = vld [vmem:[%s2285_s2 + $0x10] sm:$0xff] }
 0x1c6   : > { %v448_v17 = vmul.f32 %v1500_v16, %v440_v15  ;;  %1556 = vmatprep.subr.mxu0 %v2007_v13 }
 0x1c7   : > { %1557 = vmatpush3.msra.mxu0 %v457_v20  ;;  %v1213_v20 = vld [vmem:[%s2285_s2 + $0x8] sm:$0xff] }
 0x1c8   : > { %v456_v21 = vadd.f32 %v1501_v18, %v448_v17  ;;  %1581 = vmatprep.subr.mxu0 %v2007_v13  ;;  %v1215_v18 = vld [vmem:[%s2285_s2 + $0x18] sm:$0xff] }
 0x1ca   : > { %1559 = vmatmul.mubr.msk.f32.vlgmr.msra.gmra.mxu0 %vm461_vm2, %v456_v21  ;;  %v1212_v21 = vld [vmem:[%s2285_s2] sm:$0xff]  ;;  %p1517_p7 = scmp.ne.s32.totalorder %s2521_s18, 1 }
 0x1cb   : > { %1583 = vmatprep.mubr.msk.f32.mxu0 %vm2008_vm1, %v2007_v13 }
 0x28a   : > { %v531_v22 = vpop.f32.mrf.mxu0 }
 0x28b   : > { %540 = vrot.lane.b32.xlu1 %v531_v22, %s2009_s23  ;;  %536 = vrot.lane.b32.xlu0 %v531_v22, %s2010_s27 }
 0x28c   : > { %v1560_v23 = vpop.f32.mrf.mxu0 }
 0x28f   : > { %542 = vrot.lane.b32.xlu1 %v531_v22, %s2011_s30  ;;  %538 = vrot.lane.b32.xlu0 %v531_v22, %s2012_s20 }
 0x2fd   : > { %v2334_v24 = vpop.permute.xlu1 %540  ;;  %v537_v25 = vpop.permute.xlu0 %536 }
 0x2fe   : > { %619 = vrot.lane.b32.xlu0 %v537_v25, %s2011_s30 }
 0x301   : > { %v543_v26 = vpop.permute.xlu1 %542  ;;  %v2336_v27 = vpop.permute.xlu0 %538 }
 0x302   : > { %1562 = vmatpush3.xpose.msk.msra.mxu1 %vm544_vm3, %v543_v26  ;;  %771 = vrot.lane.b32.xlu0 %v2334_v24, %s2011_s30 }
 0x303   : > { %695 = vrot.lane.b32.xlu1 %v2336_v27, %s2011_s30  ;;  %1566 = vmatprep.subr.mxu1 %v2007_v13 }
 0x305   : > { %1564 = vmatmul.mubr.msk.f32.vlgmr.msra.gmra.mxu1 %vm544_vm3, %v531_v22 }
 0x306   : > { %1568 = vmatprep.mubr.msk.f32.mxu1 %vm2008_vm1, %v2007_v13 }
 0x370   : > { %v620_v28 = vpop.permute.xlu0 %619 }
 0x371   : > { %1567 = vmatpush3.xpose.msk.msra.mxu1 %vm544_vm3, %v620_v28 }
 0x372   : > { %1571 = vmatprep.subr.mxu1 %v2007_v13 }
 0x374   : > { %1569 = vmatmul.mubr.msk.f32.vlgmr.msra.gmra.mxu1 %vm544_vm3, %v537_v25  ;;  %v772_v30 = vpop.permute.xlu0 %771 }
 0x375   : > { %v696_v29 = vpop.permute.xlu1 %695  ;;  %1573 = vmatprep.mubr.msk.f32.mxu1 %vm2008_vm1, %v2007_v13 }
 0x376   : > { %1572 = vmatpush3.xpose.msk.msra.mxu1 %vm544_vm3, %v696_v29 }
 0x377   : > { %1576 = vmatprep.subr.mxu1 %v2007_v13 }
 0x379   : > { %1574 = vmatmul.mubr.msk.f32.vlgmr.msra.gmra.mxu1 %vm544_vm3, %v2336_v27 }
 0x37a   : > { %1577 = vmatpush3.xpose.msk.msra.mxu1 %vm544_vm3, %v772_v30  ;;  %1578 = vmatprep.mubr.msk.f32.mxu1 %vm2008_vm1, %v2007_v13 }
 0x37b   : > { %1586 = vmatprep.subr.mxu1 %v2007_v13 }
 0x37d   : > { %1579 = vmatmul.mubr.msk.f32.vlgmr.msra.gmra.mxu1 %vm544_vm3, %v2334_v24 }
 0x37e   : > { %1588 = vmatprep.mubr.msk.f32.mxu1 %vm2008_vm1, %v2007_v13 }
 0x3c5   : > { %v615_v31 = vpop.f32.mrf.mxu1 }
 0x3c6   : > { %v847_v32 = vsel %vm544_vm3, %v615_v31, -inf }
 0x3c7   : > { %v1565_v33 = vpop.f32.mrf.mxu1  ;;  %848 = vmax.xlane.f32.xlu1 %v847_v32 }
 0x3c8   : > { %v1515_v33 = vld [vmem:[%s417_s9] ss:$0 sm:$0xff] }
 0x434   : > { %v691_v34 = vpop.f32.mrf.mxu1 }
 0x435   : > { %v850_v35 = vsel %vm544_vm3, %v691_v34, -inf }
 0x436   : > { %851 = vmax.xlane.f32.xlu0 %v850_v35  ;;  %v1570_v36 = vpop.f32.mrf.mxu1 }
 0x439   : > { %v767_v37 = vpop.f32.mrf.mxu1 }
 0x43a   : > { %v853_v38 = vsel %vm544_vm3, %v767_v37, -inf }
 0x43b   : > { %854 = vmax.xlane.f32.xlu0 %v853_v38  ;;  %v1575_v39 = vpop.f32.mrf.mxu1 }
 0x43d   : > { %v843_v40 = vpop.f32.mrf.mxu1 }
 0x43e   : > { %v856_v41 = vsel %vm544_vm3, %v843_v40, -inf }
 0x43f   : > { %857 = vmax.xlane.f32.xlu1 %v856_v41  ;;  %v1580_v42 = vpop.f32.mrf.mxu1 }
 0x450   : > { %967 = vrot.lane.b32.xlu1 %v537_v25, %s2013_s10  ;;  %v849_v43 = vpop.xlane.xlu1 %848 }
 0x451   : > { %891 = vrot.lane.b32.xlu0 %v531_v22, %s2013_s10  ;;  %v859_v44 = vsub.f32 %v615_v31, %v849_v43 }
 0x453   : > { %v863_v45 = vmul.f32 1.442695, %v859_v44 }
 0x455   : > { %1743 = vpow2.f32 %v863_v45 }
 0x462   : > { %v1744_v46 = vpop.eup %1743 }
 0x463   : > { %v871_v47 = vsel %vm544_vm3, %v1744_v46, 0.0 }
 0x470   : > { %872 = vadd.xlane.f32.xlu0 %v871_v47 }
 0x4bf   : > { %v852_v48 = vpop.xlane.xlu0 %851 }
 0x4c0   : > { %v860_v49 = vsub.f32 %v691_v34, %v852_v48  ;;  %v1216_v34 = vld [vmem:[#allocation3] sm:$0xff] }
 0x4c2   : > { %v865_v50 = vmul.f32 1.442695, %v860_v49 }
 0x4c4   : > { %1745 = vpow2.f32 %v865_v50  ;;  %v855_v51 = vpop.xlane.xlu0 %854 }
 0x4c5   : > { %v861_v52 = vsub.f32 %v767_v37, %v855_v51 }
 0x4c7   : > { %v867_v53 = vmul.f32 1.442695, %v861_v52 }
 0x4c8   : > { %v858_v54 = vpop.xlane.xlu1 %857  ;;  %v892_v55 = vpop.permute.xlu0 %891 }
 0x4c9   : > { %1747 = vpow2.f32 %v867_v53  ;;  %v862_v56 = vsub.f32 %v843_v40, %v858_v54  ;;  %1582 = vmatpush3.msra.mxu0 %v892_v55 }
 0x4ca   : > { %1591 = vmatprep.subr.mxu0 %v2007_v13 }
 0x4cb   : > { %v869_v57 = vmul.f32 1.442695, %v862_v56 }
 0x4cc   : > { %v968_v58 = vpop.permute.xlu1 %967 }
 0x4cd   : > { %1749 = vpow2.f32 %v869_v57  ;;  %1587 = vmatpush3.msra.mxu1 %v968_v58 }
 0x4ce   : > { %1596 = vmatprep.subr.mxu1 %v2007_v13 }
 0x4d1   : > { %v1746_v59 = vpop.eup %1745 }
 0x4d2   : > { %v874_v60 = vsel %vm544_vm3, %v1746_v59, 0.0 }
 0x4d3   : > { %875 = vadd.xlane.f32.xlu1 %v874_v60 }
 0x4d6   : > { %v1748_v61 = vpop.eup %1747 }
 0x4d7   : > { %v877_v62 = vsel %vm544_vm3, %v1748_v61, 0.0 }
 0x4d8   : > { %878 = vadd.xlane.f32.xlu0 %v877_v62 }
 0x4da   : > { %v1750_v63 = vpop.eup %1749 }
 0x4db   : > { %v880_v0 = vsel %vm544_vm3, %v1750_v63, 0.0 }
 0x4dc   : > { %881 = vadd.xlane.f32.xlu1 %v880_v0 }
 0x4ed   : > { %1043 = vrot.lane.b32.xlu1 %v2336_v27, %s2013_s10 }
 0x4ee   : > { %1119 = vrot.lane.b32.xlu0 %v2334_v24, %s2013_s10 }
 0x4f9   : > { %v873_v1 = vpop.xlane.xlu0 %872 }
 0x4fa   : > { %1751 = vrcp.f32 %v873_v1 }
 0x507   : > { %v1752_v2 = vpop.eup %1751 }
 0x508   : > { %v887_v3 = vmul.f32 %v1752_v2, %v1744_v46 }
 0x50a   : > { %1584 = vmatmul.mubr.msk.f32.vlgmr.msra.gmra.mxu0 %vm544_vm3, %v887_v3 }
 0x50b   : > { %1593 = vmatprep.mubr.msk.f32.mxu0 %vm2008_vm1, %v2007_v13 }
 0x55c   : > { %v876_v4 = vpop.xlane.xlu1 %875 }
 0x55d   : > { %1753 = vrcp.f32 %v876_v4 }
 0x561   : > { %v879_v5 = vpop.xlane.xlu0 %878 }
 0x562   : > { %1755 = vrcp.f32 %v879_v5 }
 0x565   : > { %v882_v6 = vpop.xlane.xlu1 %881  ;;  %v1120_v10 = vpop.permute.xlu0 %1119 }
 0x566   : > { %1757 = vrcp.f32 %v882_v6 }
 0x569   : > { %v1044_v7 = vpop.permute.xlu1 %1043 }
 0x56a   : > { %v1754_v8 = vpop.eup %1753  ;;  %1592 = vmatpush3.msra.mxu0 %v1044_v7 }
 0x56b   : > { %v888_v9 = vmul.f32 %v1754_v8, %v1746_v59  ;;  %1601 = vmatprep.subr.mxu0 %v2007_v13 }
 0x56d   : > { %1589 = vmatmul.mubr.msk.f32.vlgmr.msra.gmra.mxu1 %vm544_vm3, %v888_v9 }
 0x56e   : > { %1597 = vmatpush3.msra.mxu1 %v1120_v10  ;;  %1598 = vmatprep.mubr.msk.f32.mxu1 %vm2008_vm1, %v2007_v13 }
 0x56f   : > { %v1756_v11 = vpop.eup %1755 }
 0x570   : > { %v889_v12 = vmul.f32 %v1756_v11, %v1748_v61 }
 0x572   : > { %1594 = vmatmul.mubr.msk.f32.vlgmr.msra.gmra.mxu0 %vm544_vm3, %v889_v12 }
 0x573   : > { %v1758_v14 = vpop.eup %1757  ;;  %1609 = vmatprep.mubr.msk.f32.mxu0 %vm2008_vm1, %v2007_v13  ;;  %1602 = vmatpush3.msra.mxu0 %v1215_v18 }
 0x574   : > { %v890_v15 = vmul.f32 %v1758_v14, %v1750_v63  ;;  %1603 = vmatprep.subr.mxu0 %v2007_v13 }
 0x575   : > { %1604 = vmatpush3.msra.mxu0 %v1214_v19 }
 0x576   : > { %1599 = vmatmul.mubr.msk.f32.vlgmr.msra.gmra.mxu1 %vm544_vm3, %v890_v15  ;;  %1605 = vmatprep.subr.mxu0 %v2007_v13 }
 0x577   : > { %1606 = vmatpush3.msra.mxu0 %v1213_v20 }
 0x578   : > { %1607 = vmatprep.subr.mxu0 %v2007_v13 }
 0x579   : > { %1608 = vmatpush3.msra.mxu0 %v1212_v21 }
 0x5ca   : > { %v963_v16 = vpop.f32.mrf.mxu0 }
 0x5cc   : > { %v1585_v17 = vpop.f32.mrf.mxu0 }
 0x62d   : > { %v1039_v22 = vpop.f32.mrf.mxu1 }
 0x62e   : > { %1196 = vrot.lane.b32.xlu1 %v1039_v22, %s2014_s17 }
 0x62f   : > { %v1590_v23 = vpop.f32.mrf.mxu1 }
 0x632   : > { %v1115_v24 = vpop.f32.mrf.mxu0 }
 0x633   : > { %1200 = vrot.lane.b32.xlu0 %v1115_v24, %s2015_s8 }
 0x634   : > { %v1595_v25 = vpop.f32.mrf.mxu0 }
 0x636   : > { %v1191_v26 = vpop.f32.mrf.mxu1 }
 0x637   : > { %1204 = vrot.lane.b32.xlu1 %v1191_v26, %s2016_s5 }
 0x638   : > { %v1600_v27 = vpop.f32.mrf.mxu1 }
 0x6a0   : > { %v1197_v28 = vpop.permute.xlu1 %1196 }
 0x6a1   : > { %v1207_v13 = vsel %vm544_vm3, %v963_v16, %v1197_v28 }
 0x6a5   : > { %v1201_v29 = vpop.permute.xlu0 %1200 }
 0x6a6   : > { %v1209_v30 = vsel %vm1208_vm4, %v1207_v13, %v1201_v29 }
 0x6a9   : > { %v1205_v31 = vpop.permute.xlu1 %1204 }
 0x6aa   : > { %v1211_v32 = vsel %vm1210_vm5, %v1209_v30, %v1205_v31 }
 0x6ab   : > { %1610 = vmatmul.mubr.msk.f32.vlgmr.msra.gmra.mxu0 %vm461_vm2, %v1211_v32 }
 0x76b   : > { %v1293_v35 = vpop.f32.mrf.mxu0 }
 0x76c   : > { %v1294_v36 = vadd.f32 %v1515_v33, %v1293_v35  ;;  %1302 = sbr.rel (%p1517_p7) target bundleno = 1913 (0x779), region = 68 }
 0x76d   : > { %v1611_v37 = vpop.f32.mrf.mxu0 }
 0x76e   : > { %v1297_v38 = vadd.f32 %v1294_v36, %v1216_v34 }
 0x770   : > { %1298 = vst.msk [vmem:[#allocation3] sm:$0xff] %vm461_vm2, %v1297_v38 }
 0x777   : > { %v1303_v39 = vld [vmem:[#allocation3] sm:$0xff] }
 0x778   : > { %1304 = vst.msk [vmem:[%s2303_s22] sm:$0xff] %vm461_vm2, %v1303_v39 }
 0x779 PF: > { %s2522_s19 = sld [smem:[#allocation21_spill]]  ;;  %s1319_s21 = sshll.u32 %s2303_s22, 4  ;;  %s1320_s21 = int_to_ptr.vmem [resolvable:$true] %s1319_s21 }
 0x77a   : > { %s2523_s9 = sld [smem:[#allocation31_spill]]  ;;  %s1306_s15 = scalar_lea.sflag [#allocation6], %s2264_s28 }
 0x77b   : > { %s1871_s23 = scalar_lea.vmem %s1320_s21, 128  ;;  %p2524_p8 = scmp.ne.s32.totalorder %s2504_s12, 0 }
 0x77c   : > { %p1872_p12 = scmp.ne.s32.totalorder %s1320_s21, %s1871_s23  ;;  %s2017_s27 = smov [#allocation12]  }
 0x77d   : > { %s1875_s30 = sshll.u32 %s2017_s27, 4  ;;  %s1876_s30 = int_to_ptr.vmem [resolvable:$false] %s1875_s30 }
 0x77e   : > { %p1873_p1 = pnand %p1872_p12, %p2524_p8  ;;  %s1877_s20 = scalar_lea.vmem %s1876_s30, 256 }
 0x77f   : > { %s1519_s1 = sshll.u32 %s2522_s19, 7  ;;  %p1878_p3 = scmp.lt.s32.totalorder %s1320_s21, %s1876_s30 }
 0x780   : > { %s1317_s14 = scalar_lea.hbm %s2523_s9, %s1519_s1  ;;  %p1874_p0 = pneg %p1873_p1 }
 0x781   : > { %p1879_p2 = scmp.lt.s32.totalorder %s1877_s20, %s1871_s23 }
 0x783   : > { %p1880_p10 = por %p1879_p2, %p1878_p3 }
 0x785   : > { %p1881_p4 = pnand %p1880_p10, %p1874_p0 }
 0x787   : > { %1884 = shalt.err (!%p1881_p4)
}
 0x788   : > { %s1885_s10 = scalar_lea.hbm %s1317_s14, 128  ;;  %s1889_s17 = scalar_lea.hbm %s2523_s9, 256 }
 0x789   : > { %p1886_p5 = scmp.ne.s32.totalorder %s1317_s14, %s1885_s10  ;;  %p1890_p9 = scmp.lt.s32.totalorder %s1317_s14, %s2523_s9 }
 0x78a   : > { %p1891_p13 = scmp.lt.s32.totalorder %s1889_s17, %s1885_s10 }
 0x78b   : > { %p1887_p6 = pnand %p1886_p5, %p2524_p8 }
 0x78c   : > { %p1892_p7 = por %p1891_p13, %p1890_p9 }
 0x78d   : > { %p1888_p11 = pneg %p1887_p6 }
 0x78f   : > { %p1893_p12 = pnand %p1892_p7, %p1888_p11 }
 0x791   : > { %1896 = shalt.err (!%p1893_p12)
}
 0x792   : > { %1620 = dma.vmem_to_hbm [thread:$0]  (%p2524_p8), %s1320_s21, 128, %s1317_s14, %s1306_s15  }
 0x793 PF: > { %s2525_s2 = sld [smem:[#allocation19_spill]]  ;;  %p1640_p1 = scmp.ge.s32.totalorder %s1999_s7, 2 }
 0x794   : > { %p2526_p0 = scmp.ne.s32.totalorder %s2505_s11, 0 }
 0x796   : > { %p1636_p3 = pnand %p1640_p1, %p2526_p0 }
 0x798   : > { %p1637_p2 = pneg %p1636_p3 }
 0x799   : > { %s1331_s24 = sand.u32 1, %s2525_s2  }
 0x79a   : > { %s1332_s13 = scalar_lea.sflag [#allocation6], %s1331_s24 }
 0x79b   : > { %1954 = dma.done.wait (%p1637_p2), %s1332_s13, 128  }
 0x79c   : > { %1956 = vsyncadd (%p1637_p2), %s1332_s13, 4294967168  ;;  %s28_s7 = sadd.s32 1, %s1999_s7   ;;  %s2527_s21 = sld [smem:[#allocation17_spill]] }
 0x79d   : > { %p25_p10 = scmp.ge.s32.totalorder %s28_s7, 6   ;;  %s2528_s22 = sld [smem:[#allocation18_spill]] }
 0x79e   : > { %s2529_s23 = sld [smem:[#allocation25_spill]]  ;;  %s2534_s24 = smov %s1975_s25 }
 0x79f   : > { %s2530_s12 = sld [smem:[#allocation27_spill]]  ;;  %s2535_s25 = smov %s1979_s26 }
 0x7a0   : > { %s2531_s28 = sld [smem:[#allocation22_spill]]  ;;  %s2537_s27 = smov %s1991_s29 }
 0x7a1   : > { %s2532_s18 = sld [smem:[#allocation23_spill]] }
 0x7a2   : > { %s2533_s30 = sld [smem:[#allocation26_spill]] }
 0x7a3   :  { %27 = sbr.rel (!%p25_p10) target bundleno = 18 (0x12), region = 140 }
 0x7a5   : > { %s2536_s26 = smov %s2530_s12 }
 0x7a7   : > { %s2538_s29 = smov %s2532_s18 }
 0x7a8   :  { %1337 = vsyncpa [#allocation5], 1 }
 0x7a9   :  { %1339 = vsyncpa [#allocation5 + $0x1], 1 }
 0x7aa   :  { %1340 = vsyncpa [#allocation8], 1 }
 0x7ab   :  { %1342 = vsyncpa [#allocation8 + $0x1], 1 }
 0x7ac   :  { %1343 = vsyncpa [#allocation11], 1 }
 0x7ad   :  { %1345 = vsyncpa [#allocation11 + $0x1], 1 }
 0x7ae   :  { %1346 = vsyncpa [#allocation6], 1 }
 0x7af   :  { %1348 = vsyncpa [#allocation6 + $0x1], 1 }

</bundles_post_ra>
